<compile_context>
chip_gen: v5e
topology: v5e:2x2
jax: 0.10.0
libtpu: 0.0.40
codegen_flags: <defaults>
</compile_context>

<pallas_src>
import functools

import jax
import jax.numpy as jnp
from jax import lax
from jax.experimental import pallas as pl
from jax.experimental.pallas import tpu as pltpu


def _round_up(n: int, m: int) -> int:
    return ((n + m - 1) // m) * m


def _simple_nn_kernel(x_ref, w1_ref, b1_ref, w2_ref, b2_ref, w3d_ref, b3d_ref,
                      outT_ref, *, chunk_b: int):
    # x_ref:    (TILE_B, IN)  native layout -> one contiguous HBM DMA per tile
    # outT_ref: (2, TILE_B)   lane-dense probabilities (batch on the lane axis)
    w1 = w1_ref[...]        # (32, IN)
    b1 = b1_ref[...]        # (32, 1)
    w2 = w2_ref[...]        # (12, 32)
    b2 = b2_ref[...]        # (12, 1)
    w3d = w3d_ref[...]      # (2, 12)  difference-folded fc3
    b3d = b3d_ref[...]      # (2, 1)

    n_chunks = x_ref.shape[0] // chunk_b  # static; tile_b is a multiple of chunk_b

    def body(c, carry):
        start = pl.multiple_of(c * chunk_b, chunk_b)
        xc = x_ref[pl.ds(start, chunk_b), :]                        # (CB, IN)

        # fc1 + relu: contract the shared IN axis of W1^T and the native-layout
        # x chunk -> (32, CB) with batch on the 128-lane axis.
        h1 = lax.dot_general(w1, xc, (((1,), (1,)), ((), ())),
                             preferred_element_type=jnp.float32)
        h1 = jnp.maximum(h1 + b1, 0.0)

        # fc2 + relu -> (12, CB)
        h2 = jnp.dot(w2, h1, preferred_element_type=jnp.float32)
        h2 = jnp.maximum(h2 + b2, 0.0)

        # fc3 + 2-class softmax, folded: row j of d is logits_j - logits_{1-j},
        # so softmax_j == sigmoid(d_j) exactly (stable: exp saturates cleanly).
        d = jnp.dot(w3d, h2, preferred_element_type=jnp.float32) + b3d
        outT_ref[:, pl.ds(start, chunk_b)] = 1.0 / (1.0 + jnp.exp(-d))
        return carry

    lax.fori_loop(0, n_chunks, body, 0)


def simple_nn_forward(x, params, *, tile_b: int = 32768, chunk_b: int = 1024):
    """x: (B, input_size) float32; params: dict of weights/biases (torch layout)."""
    B, in_size = x.shape

    # --- batch tile selection -------------------------------------------------
    # Lane-aligned (multiple of 128); keep >= 2 grid tiles when B allows (v7x
    # megacore); cap by a conservative VMEM budget assuming the narrow x tile is
    # lane-padded to 128 inside VMEM:
    #   per batch row: 2*roundup(in,128)*4 B (x double buffer)
    #                + 2*8*4 B               (out double buffer, 2 -> 8 sublanes)
    per_row_vmem = 2 * _round_up(in_size, 128) * 4 + 2 * 8 * 4
    vmem_budget = 40 << 20                               # leaves headroom on v7x (64 MiB)
    tile_cap = max(128, ((vmem_budget // per_row_vmem) // 128) * 128)

    tile_b = min(tile_b, _round_up(pl.cdiv(B, 2), 128), tile_cap)
    tile_b = max(tile_b, 128)
    chunk_b = max(128, min(chunk_b, tile_b))
    tile_b = _round_up(tile_b, chunk_b)                  # in-kernel chunks tile evenly
    num_tiles = pl.cdiv(B, tile_b)                       # ragged tail handled by Pallas

    # Explicit scoped-VMEM limit sized from the (padded) estimate: covers v5e's
    # 16 MiB default, stays below v7x's 64 MiB physical VMEM.
    vmem_limit = int(min(56 << 20,
                         max(tile_b * per_row_vmem + (4 << 20), 16 << 20)))

    # Tiny weight-prep (negligible vs x traffic): transposed so activations are
    # (features, batch); fc3 folded with the 2-class-softmax identity.
    w1T = params["w1"].T                                  # (32, in)
    b1c = params["b1"].reshape(1, -1).T                   # (32, 1)
    w2T = params["w2"].T                                  # (12, 32)
    b2c = params["b2"].reshape(1, -1).T                   # (12, 1)
    w3 = params["w3"]                                     # (12, 2)
    b3 = params["b3"].reshape(-1)                         # (2,)
    w3d = jnp.stack([w3[:, 0] - w3[:, 1], w3[:, 1] - w3[:, 0]], axis=0)  # (2, 12)
    b3d = jnp.stack([b3[0] - b3[1], b3[1] - b3[0]]).reshape(2, 1)        # (2, 1)

    resident = lambda a: pl.BlockSpec(a.shape, lambda i: (0, 0))  # VMEM-resident

    outT = pl.pallas_call(
        functools.partial(_simple_nn_kernel, chunk_b=chunk_b),
        out_shape=jax.ShapeDtypeStruct((2, B), jnp.float32),
        grid=(num_tiles,),
        in_specs=[
            pl.BlockSpec((tile_b, in_size), lambda i: (i, 0)),   # x: native layout, contiguous DMA
            resident(w1T), resident(b1c),
            resident(w2T), resident(b2c),
            resident(w3d), resident(b3d),
        ],
        out_specs=pl.BlockSpec((2, tile_b), lambda i: (0, i)),   # lane-dense output tile
        compiler_params=pltpu.CompilerParams(
            dimension_semantics=("parallel",),                   # megacore split on v7x
            vmem_limit_bytes=vmem_limit,
        ),
    )(x, w1T, b1c, w2T, b2c, w3d, b3d)

    # TODO(synk): fuse this final (2, B) -> (B, 2) transpose into the consumer.
    return outT.T


def init_params(key, input_size):
    """Deterministic init matching the nn.Linear shapes in SimpleNN.__init__."""
    ks = jax.random.split(key, 6)

    def linear(kw, kb, fan_in, fan_out):
        # torch default: U(-1/sqrt(fan_in), 1/sqrt(fan_in))
        bound = 1.0 / jnp.sqrt(fan_in)
        w = jax.random.uniform(kw, (fan_in, fan_out), jnp.float32, -bound, bound)
        b = jax.random.uniform(kb, (1, fan_out), jnp.float32, -bound, bound)
        return w, b

    w1, b1 = linear(ks[0], ks[1], input_size, 32)
    w2, b2 = linear(ks[2], ks[3], 32, 12)
    w3, b3 = linear(ks[4], ks[5], 12, 2)
    return {"w1": w1, "b1": b1, "w2": w2, "b2": b2, "w3": w3, "b3": b3}


def _reference(x, params):
    h1 = jnp.maximum(x @ params["w1"] + params["b1"], 0.0)
    h2 = jnp.maximum(h1 @ params["w2"] + params["b2"], 0.0)
    return jax.nn.softmax(h2 @ params["w3"] + params["b3"], axis=1)


if __name__ == "__main__":
    key = jax.random.PRNGKey(0)
    k_x, k_p, k_x2 = jax.random.split(key, 3)

    batch, input_size = 8, 16
    x = jax.random.normal(k_x, (batch, input_size), dtype=jnp.float32)
    params = init_params(k_p, input_size)

    out = jax.block_until_ready(simple_nn_forward(x, params))
    assert out.shape == (batch, 2)
    assert jnp.allclose(jnp.sum(out, axis=1), 1.0, atol=1e-5)
    assert jnp.allclose(out, _reference(x, params), atol=1e-5)

    # Multi-tile grid + ragged tail block (300 rows, no host-side padding).
    x2 = jax.random.normal(k_x2, (300, input_size), dtype=jnp.float32)
    ref2 = _reference(x2, params)
    out2 = jax.block_until_ready(simple_nn_forward(x2, params))               # 2 tiles of 256
    out3 = jax.block_until_ready(simple_nn_forward(x2, params, tile_b=128))   # 3 tiles of 128
    for o in (out2, out3):
        assert o.shape == (300, 2)
        assert jnp.allclose(jnp.sum(o, axis=1), 1.0, atol=1e-5)
        assert jnp.allclose(o, ref2, atol=1e-5)

    print("KERNEL_OK")
</pallas_src>

<mosaic_0001>
module attributes {stable_mosaic.version = 11 : i64} {
  func.func @_simple_nn_kernel(%arg0: i32, %arg1: memref<128x16xf32, #tpu.memory_space<vmem>>, %arg2: memref<32x16xf32, #tpu.memory_space<vmem>>, %arg3: memref<32x1xf32, #tpu.memory_space<vmem>>, %arg4: memref<12x32xf32, #tpu.memory_space<vmem>>, %arg5: memref<12x1xf32, #tpu.memory_space<vmem>>, %arg6: memref<2x12xf32, #tpu.memory_space<vmem>>, %arg7: memref<2x1xf32, #tpu.memory_space<vmem>>, %arg8: memref<2x128xf32, #tpu.memory_space<vmem>>) attributes {dimension_semantics = [#tpu.dimension_semantics<parallel>], iteration_bounds = array<i64: 1>, scalar_prefetch = 0 : i64, scratch_operands = 0 : i64, tpu.core_type = #tpu.core_type<tc>, window_params = [{transform_indices = @transform_0, window_bounds = array<i64: 128, 16>}, {pipeline_mode = #tpu.pipeline_mode<synchronous>, transform_indices = @transform_1, window_bounds = array<i64: 32, 16>}, {pipeline_mode = #tpu.pipeline_mode<synchronous>, transform_indices = @transform_2, window_bounds = array<i64: 32, 1>}, {pipeline_mode = #tpu.pipeline_mode<synchronous>, transform_indices = @transform_3, window_bounds = array<i64: 12, 32>}, {pipeline_mode = #tpu.pipeline_mode<synchronous>, transform_indices = @transform_4, window_bounds = array<i64: 12, 1>}, {pipeline_mode = #tpu.pipeline_mode<synchronous>, transform_indices = @transform_5, window_bounds = array<i64: 2, 12>}, {pipeline_mode = #tpu.pipeline_mode<synchronous>, transform_indices = @transform_6, window_bounds = array<i64: 2, 1>}, {transform_indices = @transform_7, window_bounds = array<i64: 2, 128>}]} {
    %c0 = arith.constant 0 : index
    %c0_0 = arith.constant 0 : index
    %0 = vector.load %arg2[%c0, %c0_0] : memref<32x16xf32, #tpu.memory_space<vmem>>, vector<32x16xf32>
    %c0_1 = arith.constant 0 : index
    %c0_2 = arith.constant 0 : index
    %1 = vector.load %arg3[%c0_1, %c0_2] : memref<32x1xf32, #tpu.memory_space<vmem>>, vector<32x1xf32>
    %c0_3 = arith.constant 0 : index
    %c0_4 = arith.constant 0 : index
    %2 = vector.load %arg4[%c0_3, %c0_4] : memref<12x32xf32, #tpu.memory_space<vmem>>, vector<12x32xf32>
    %c0_5 = arith.constant 0 : index
    %c0_6 = arith.constant 0 : index
    %3 = vector.load %arg5[%c0_5, %c0_6] : memref<12x1xf32, #tpu.memory_space<vmem>>, vector<12x1xf32>
    %c0_7 = arith.constant 0 : index
    %c0_8 = arith.constant 0 : index
    %4 = vector.load %arg6[%c0_7, %c0_8] : memref<2x12xf32, #tpu.memory_space<vmem>>, vector<2x12xf32>
    %c0_9 = arith.constant 0 : index
    %c0_10 = arith.constant 0 : index
    %5 = vector.load %arg7[%c0_9, %c0_10] : memref<2x1xf32, #tpu.memory_space<vmem>>, vector<2x1xf32>
    %c0_i32 = arith.constant 0 : i32
    %c128_i32 = arith.constant 128 : i32
    %6 = arith.muli %c0_i32, %c128_i32 : i32
    %7 = tpu.assume_multiple %6, 128 : i32
    %8 = arith.index_cast %7 : i32 to index
    %c0_11 = arith.constant 0 : index
    %9 = vector.load %arg1[%8, %c0_11] : memref<128x16xf32, #tpu.memory_space<vmem>>, vector<128x16xf32>
    %cst = arith.constant dense<0.000000e+00> : vector<32x128xf32>
    %10 = tpu.matmul %0, %9, %cst {dimension_numbers = #tpu.dot_dimension_numbers<[1], [1], [0], [0], [0, 0, 1, 0], [], []>} : vector<32x16xf32>, vector<128x16xf32>, vector<32x128xf32> -> vector<32x128xf32>
    %11 = vector.broadcast %1 : vector<32x1xf32> to vector<32x128xf32>
    %12 = arith.addf %10, %11 : vector<32x128xf32>
    %cst_12 = arith.constant 0.000000e+00 : f32
    %13 = vector.broadcast %cst_12 : f32 to vector<32x128xf32>
    %14 = arith.maximumf %12, %13 : vector<32x128xf32>
    %cst_13 = arith.constant dense<0.000000e+00> : vector<12x128xf32>
    %15 = tpu.matmul %2, %14, %cst_13 {dimension_numbers = #tpu.dot_dimension_numbers<[1], [0], [0], [1], [0, 0, 1, 1], [], []>} : vector<12x32xf32>, vector<32x128xf32>, vector<12x128xf32> -> vector<12x128xf32>
    %16 = vector.broadcast %3 : vector<12x1xf32> to vector<12x128xf32>
    %17 = arith.addf %15, %16 : vector<12x128xf32>
    %cst_14 = arith.constant 0.000000e+00 : f32
    %18 = vector.broadcast %cst_14 : f32 to vector<12x128xf32>
    %19 = arith.maximumf %17, %18 : vector<12x128xf32>
    %cst_15 = arith.constant dense<0.000000e+00> : vector<2x128xf32>
    %20 = tpu.matmul %4, %19, %cst_15 {dimension_numbers = #tpu.dot_dimension_numbers<[1], [0], [0], [1], [0, 0, 1, 1], [], []>} : vector<2x12xf32>, vector<12x128xf32>, vector<2x128xf32> -> vector<2x128xf32>
    %21 = vector.broadcast %5 : vector<2x1xf32> to vector<2x128xf32>
    %22 = arith.addf %20, %21 : vector<2x128xf32>
    %cst_16 = arith.constant 0.000000e+00 : f32
    %23 = vector.broadcast %cst_16 : f32 to vector<2x128xf32>
    %24 = arith.subf %23, %22 : vector<2x128xf32>
    %25 = math.exp %24 : vector<2x128xf32>
    %cst_17 = arith.constant 1.000000e+00 : f32
    %26 = vector.broadcast %cst_17 : f32 to vector<2x128xf32>
    %27 = arith.addf %26, %25 : vector<2x128xf32>
    %cst_18 = arith.constant 1.000000e+00 : f32
    %28 = vector.broadcast %cst_18 : f32 to vector<2x128xf32>
    %29 = arith.divf %28, %27 : vector<2x128xf32>
    %c0_19 = arith.constant 0 : index
    %30 = arith.index_cast %7 : i32 to index
    %31 = vector.load %arg8[%c0_19, %30] : memref<2x128xf32, #tpu.memory_space<vmem>>, vector<2x128xf32>
    tpu.vector_store %arg8[%c0_19, %30], %29 {strides = array<i32>} : memref<2x128xf32, #tpu.memory_space<vmem>>, vector<2x128xf32>,
    %c1_i32 = arith.constant 1 : i32
    return
  }
  func.func @transform_0(%arg0: i32) -> (i32, i32) {
    %c0_i32 = arith.constant 0 : i32
    %c0_i32_0 = arith.constant 0 : i32
    return %arg0, %c0_i32 : i32, i32
  }
  func.func @transform_1(%arg0: i32) -> (i32, i32) {
    %c0_i32 = arith.constant 0 : i32
    %c0_i32_0 = arith.constant 0 : i32
    %c0_i32_1 = arith.constant 0 : i32
    return %c0_i32, %c0_i32_0 : i32, i32
  }
  func.func @transform_2(%arg0: i32) -> (i32, i32) {
    %c0_i32 = arith.constant 0 : i32
    %c0_i32_0 = arith.constant 0 : i32
    %c0_i32_1 = arith.constant 0 : i32
    return %c0_i32, %c0_i32_0 : i32, i32
  }
  func.func @transform_3(%arg0: i32) -> (i32, i32) {
    %c0_i32 = arith.constant 0 : i32
    %c0_i32_0 = arith.constant 0 : i32
    %c0_i32_1 = arith.constant 0 : i32
    return %c0_i32, %c0_i32_0 : i32, i32
  }
  func.func @transform_4(%arg0: i32) -> (i32, i32) {
    %c0_i32 = arith.constant 0 : i32
    %c0_i32_0 = arith.constant 0 : i32
    %c0_i32_1 = arith.constant 0 : i32
    return %c0_i32, %c0_i32_0 : i32, i32
  }
  func.func @transform_5(%arg0: i32) -> (i32, i32) {
    %c0_i32 = arith.constant 0 : i32
    %c0_i32_0 = arith.constant 0 : i32
    %c0_i32_1 = arith.constant 0 : i32
    return %c0_i32, %c0_i32_0 : i32, i32
  }
  func.func @transform_6(%arg0: i32) -> (i32, i32) {
    %c0_i32 = arith.constant 0 : i32
    %c0_i32_0 = arith.constant 0 : i32
    %c0_i32_1 = arith.constant 0 : i32
    return %c0_i32, %c0_i32_0 : i32, i32
  }
  func.func @transform_7(%arg0: i32) -> (i32, i32) {
    %c0_i32 = arith.constant 0 : i32
    %c0_i32_0 = arith.constant 0 : i32
    return %c0_i32, %arg0 : i32, i32
  }
}

</mosaic_0001>

<bundles_post_ra>
// kernel: tpu_custom_call.1
= control target key start
LH: loop header
LB: loop body
LE: loop exit
PB: predicated region body
PF: predicated region fallthrough
CT: control target
= control target key end

     0   :  { %vm77_vm0 = vcmask 130048   ;;  %s528_s0 = inlined_call_operand.vmem [shape: f32[8,16], index: 0, kind: input, shape index: {}]   ;;  %s529_s1 = inlined_call_operand.vmem [shape: f32[32,16], index: 1, kind: input, shape index: {}]   ;;  %s530_s2 = inlined_call_operand.vmem [shape: f32[32,1], index: 2, kind: input, shape index: {}]   ;;  %s531_s3 = inlined_call_operand.vmem [shape: f32[12,32], index: 3, kind: input, shape index: {}]   ;;  %s532_s4 = inlined_call_operand.vmem [shape: f32[12,1], index: 4, kind: input, shape index: {}]   ;;  %s533_s5 = inlined_call_operand.vmem [shape: f32[2,12], index: 5, kind: input, shape index: {}]   ;;  %s534_s6 = inlined_call_operand.vmem [shape: f32[2,1], index: 6, kind: input, shape index: {}]   ;;  %s535_s7 = inlined_call_operand.hbm [shape: f32[2,8], index: 7, kind: output, shape index: {}]  }
   0x1   :  { %v56_v0 = vld [vmem:[%s528_s0 + $0x78] sm:$0xff]  ;;  %v55_v1 = vld [vmem:[%s528_s0 + $0x70] sm:$0xff] }
   0x2   :  { %306 = vmatpush.xpose.msk.msra.mxu3 %vm77_vm0, %v56_v0  ;;  %282 = vmatpush.xpose.msk.msra.mxu0 %vm77_vm0, %v56_v0 }
   0x3   :  { %12 = vsyncpa [#allocation3], 0  ;;  %v54_v2 = vld [vmem:[%s528_s0 + $0x68] sm:$0xff]  ;;  %v53_v3 = vld [vmem:[%s528_s0 + $0x60] sm:$0xff]  ;;  %v357_v13 = vmov 0   ;;  %vm181_vm1 = vcmask 261120  }
   0x4   :  { %v52_v4 = vld [vmem:[%s528_s0 + $0x58] sm:$0xff]  ;;  %v51_v5 = vld [vmem:[%s528_s0 + $0x50] sm:$0xff]  ;;  %v50_v6 = vld [vmem:[%s528_s0 + $0x48] sm:$0xff]  ;;  %324 = vset.pattern.permute.xlu0 %v357_v13  ;;  %325 = vset.pattern.permute.xlu1 %v357_v13  ;;  %vm222_vm2 = vcmask 1043456   ;;  %vm218_vm3 = vcmask 97280   ;;  %s273_s12 = sshll.u32 %s535_s7, 4  ;;  %s274_s12 = int_to_ptr.hbm [resolvable:$true] %s273_s12 }
   0x5   :  { %v49_v7 = vld [vmem:[%s528_s0 + $0x40] sm:$0xff]  ;;  %v48_v8 = vld [vmem:[%s528_s0 + $0x38] sm:$0xff]  ;;  %v47_v9 = vld [vmem:[%s528_s0 + $0x30] sm:$0xff]  ;;  %326 = vset.pattern.permute.xlu2 %v357_v13 }
   0x6   :  { %307 = vmatpush.xpose.msk.msra.mxu3 %vm77_vm0, %v55_v1  ;;  %283 = vmatpush.xpose.msk.msra.mxu0 %vm77_vm0, %v55_v1  ;;  %v46_v10 = vld [vmem:[%s528_s0 + $0x28] sm:$0xff]  ;;  %v34_v11 = vld [vmem:[%s530_s2 + $0x18] sm:$0xff]  ;;  %v45_v12 = vld [vmem:[%s528_s0 + $0x20] sm:$0xff] }
   0x7   :  { %74 = vperm.xlu0 %324, %v34_v11   ;;  %v44_v14 = vld [vmem:[%s528_s0 + $0x18] sm:$0xff]  ;;  %v32_v15 = vld [vmem:[%s530_s2 + $0x8] sm:$0xff]  ;;  %v33_v16 = vld [vmem:[%s530_s2 + $0x10] sm:$0xff] }
   0x8   :  { %v43_v17 = vld [vmem:[%s528_s0 + $0x10] sm:$0xff]  ;;  %64 = vperm.xlu1 %325, %v32_v15   ;;  %v42_v18 = vld [vmem:[%s528_s0 + $0x8] sm:$0xff]  ;;  %v31_v19 = vld [vmem:[%s530_s2] sm:$0xff] }
   0x9   :  { %v40_v20 = vld [vmem:[%s534_s6] sm:$0x3]  ;;  %v28_v22 = vld [vmem:[%s529_s1 + $0x8] sm:$0xff]  ;;  %v29_v24 = vld [vmem:[%s529_s1 + $0x10] sm:$0xff] }
   0xa   :  { %308 = vmatpush.xpose.msk.msra.mxu3 %vm77_vm0, %v54_v2  ;;  %284 = vmatpush.xpose.msk.msra.mxu0 %vm77_vm0, %v54_v2  ;;  %v41_v21 = vld [vmem:[%s528_s0] sm:$0xff]  ;;  %v30_v25 = vld [vmem:[%s529_s1 + $0x18] sm:$0xff]  ;;  %v38_v27 = vld [vmem:[%s532_s4 + $0x8] sm:$0xf] }
   0xb   :  { %v27_v23 = vld [vmem:[%s529_s1] sm:$0xff]  ;;  %178 = vperm.xlu2 %326, %v38_v27   ;;  %v36_v45 = vld [vmem:[%s531_s3 + $0x8] sm:$0xf] }
   0xc   :  { %v37_v31 = vld [vmem:[%s532_s4] sm:$0xff] }
   0xd   :  { %v35_v44 = vld [vmem:[%s531_s3] sm:$0xff]  ;;  %s358_s3 = smov [#allocation2]  }
   0xe   :  { %309 = vmatpush.xpose.msk.msra.mxu3 %vm77_vm0, %v53_v3  ;;  %285 = vmatpush.xpose.msk.msra.mxu0 %vm77_vm0, %v53_v3  ;;  %v39_v54 = vld [vmem:[%s533_s5] sm:$0x3]  ;;  %s271_s5 = sshll.u32 %s358_s3, 4  ;;  %s272_s5 = int_to_ptr.vmem [resolvable:$true] %s271_s5 }
   0xf   :  { %69 = vperm.xlu0 %324, %v33_v16  }
  0x10   :  { %59 = vperm.xlu1 %325, %v31_v19  }
  0x12   :  { %310 = vmatpush.xpose.msk.msra.mxu3 %vm77_vm0, %v52_v4  ;;  %286 = vmatpush.xpose.msk.msra.mxu0 %vm77_vm0, %v52_v4 }
  0x13   :  { %173 = vperm.xlu2 %326, %v37_v31  }
  0x16   :  { %311 = vmatpush.xpose.msk.msra.mxu3 %vm77_vm0, %v51_v5  ;;  %287 = vmatpush.xpose.msk.msra.mxu0 %vm77_vm0, %v51_v5 }
  0x17   :  { %215 = vperm.xlu0 %324, %v40_v20  }
  0x1a   :  { %312 = vmatpush.xpose.msk.msra.mxu3 %vm77_vm0, %v50_v6  ;;  %288 = vmatpush.xpose.msk.msra.mxu0 %vm77_vm0, %v50_v6 }
  0x1e   :  { %313 = vmatpush.xpose.msk.msra.mxu3 %vm77_vm0, %v49_v7  ;;  %289 = vmatpush.xpose.msk.msra.mxu0 %vm77_vm0, %v49_v7 }
  0x22   :  { %314 = vmatpush.xpose.msk.msra.mxu3 %vm77_vm0, %v48_v8  ;;  %290 = vmatpush.xpose.msk.msra.mxu0 %vm77_vm0, %v48_v8 }
  0x26   :  { %315 = vmatpush.xpose.msk.msra.mxu3 %vm77_vm0, %v47_v9  ;;  %291 = vmatpush.xpose.msk.msra.mxu0 %vm77_vm0, %v47_v9 }
  0x2a   :  { %316 = vmatpush.xpose.msk.msra.mxu3 %vm77_vm0, %v46_v10  ;;  %292 = vmatpush.xpose.msk.msra.mxu0 %vm77_vm0, %v46_v10 }
  0x2e   :  { %317 = vmatpush.xpose.msk.msra.mxu3 %vm77_vm0, %v45_v12  ;;  %293 = vmatpush.xpose.msk.msra.mxu0 %vm77_vm0, %v45_v12 }
  0x32   :  { %318 = vmatpush.xpose.msk.msra.mxu3 %vm77_vm0, %v44_v14  ;;  %294 = vmatpush.xpose.msk.msra.mxu0 %vm77_vm0, %v44_v14 }
  0x36   :  { %319 = vmatpush.xpose.msk.msra.mxu3 %vm77_vm0, %v43_v17  ;;  %295 = vmatpush.xpose.msk.msra.mxu0 %vm77_vm0, %v43_v17 }
  0x3a   :  { %320 = vmatpush.xpose.msk.msra.mxu3 %vm77_vm0, %v42_v18  ;;  %296 = vmatpush.xpose.msk.msra.mxu0 %vm77_vm0, %v42_v18 }
  0x3e   :  { %321 = vmatpush.xpose.msk.msra.mxu3 %vm77_vm0, %v41_v21  ;;  %297 = vmatpush.xpose.msk.msra.mxu0 %vm77_vm0, %v41_v21 }
  0x41   :  { %299 = vmatmul.msk.f32.vlgmr.msra.gmra.mxu3 %vm77_vm0, %v28_v22  ;;  %298 = vmatmul.msk.f32.vlgmr.msra.gmra.mxu0 %vm77_vm0, %v27_v23 }
  0x49   :  { %300 = vmatmul.msk.f32.gmra.mxu3 %vm77_vm0, %v29_v24 }
  0x51   :  { %301 = vmatmul.msk.f32.gmra.mxu3 %vm77_vm0, %v30_v25 }
  0x65   :  { %v179_v46 = vpop.permute.xlu2 %178 }
  0x6d   :  { %v174_v48 = vpop.permute.xlu2 %173 }
  0x79   :  { %v75_v28 = vpop.permute.xlu0 %74 }
  0x7a   :  { %v65_v30 = vpop.permute.xlu1 %64 }
  0x81   :  { %v70_v32 = vpop.permute.xlu0 %69 }
  0x82   :  { %v60_v36 = vpop.permute.xlu1 %59 }
  0x89   :  { %v216_v55 = vpop.permute.xlu0 %215 }
  0xbe   :  { %v155_v37 = vpop.f32.mrf.mxu0 }
  0xbf   :  { %v156_v41 = vadd.f32 %v155_v37, %v60_v36 }
  0xc1   :  { %v167_v43 = vmax.f32 %v156_v41, 0.0 }
  0xc4   :  { %v158_v26 = vpop.f32.mrf.mxu3 }
  0xc5   :  { %v159_v38 = vadd.f32 %v158_v26, %v65_v30 }
  0xc7   :  { %v168_v42 = vmax.f32 %v159_v38, 0.0 }
  0xcc   :  { %v161_v29 = vpop.f32.mrf.mxu3 }
  0xcd   :  { %v162_v34 = vadd.f32 %v161_v29, %v70_v32 }
  0xcf   :  { %v169_v40 = vmax.f32 %v162_v34, 0.0 }
  0xd4   :  { %v164_v33 = vpop.f32.mrf.mxu3 }
  0xd5   :  { %v165_v35 = vadd.f32 %v164_v33, %v75_v28 }
  0xd7   :  { %v170_v39 = vmax.f32 %v165_v35, 0.0 }
  0xd9   :  { %200 = vmatpush.msra.mxu1 %v170_v39 }
  0xdb   :  { %201 = vmatpush.msra.mxu1 %v169_v40 }
  0xdd   :  { %202 = vmatpush.msra.mxu1 %v168_v42 }
  0xdf   :  { %203 = vmatpush.msra.mxu1 %v167_v43 }
  0xe0   :  { %302 = vmatmul.msk.f32.vlgmr.msra.gmra.mxu1 %vm181_vm1, %v35_v44 }
  0xe8   :  { %303 = vmatmul.msk.f32.gmra.mxu1 %vm181_vm1, %v36_v45 }
 0x15d   :  { %v205_v47 = vpop.f32.mrf.mxu1 }
 0x15e   :  { %v206_v50 = vadd.f32 %v205_v47, %v174_v48 }
 0x160   :  { %v211_v53 = vmax.f32 %v206_v50, 0.0 }
 0x165   :  { %v208_v49 = vpop.f32.mrf.mxu1 }
 0x166   :  { %v209_v51 = vadd.f32 %v208_v49, %v179_v46 }
 0x168   :  { %v212_v52 = vmax.f32 %v209_v51, 0.0 }
 0x16a   :  { %304 = vmatpush.msk.msra.mxu2 %vm222_vm2, %v212_v52 }
 0x16c   :  { %241 = vmatpush.msra.mxu2 %v211_v53 }
 0x16d   :  { %305 = vmatmul.msk.f32.vlgmr.msra.gmra.mxu2 %vm218_vm3, %v39_v54 }
 0x1f0   :  { %v243_v56 = vpop.f32.mrf.mxu2 }
 0x1f1   :  { %v244_v57 = vadd.f32 %v243_v56, %v216_v55 }
 0x1f3   :  { %v246_v58 = vsub.f32 0.0, %v244_v57 }
 0x1f5   :  { %v247_v59 = vmul.f32 1.442695, %v246_v58 }
 0x1f7   :  { %327 = vpow2.f32 %v247_v59 }
 0x1fd   :  { %v328_v60 = vpop.eup %327 }
 0x1fe   :  { %v249_v61 = vadd.f32 1.0, %v328_v60 }
 0x200   :  { %329 = vrcp.f32 %v249_v61  ;;  %v261_v1 = vand.u32 2147483648, %v249_v61  ;;  %v259_v3 = vand.u32 2147483647, %v249_v61  ;;  %vm255_vm5 = vweird.f32 %v249_v61 }
 0x202   :  { %v262_v5 = vor.u32 1.1754944e-38, %v261_v1  ;;  %vm260_vm7 = vcmp.eq.f32.partialorder %v259_v3, 8.507059e+37 }
 0x206   :  { %v330_v62 = vpop.eup %329 }
 0x207   :  { %v251_v63 = vmul.f32 %v330_v62, %v249_v61  ;;  %vm256_vm4 = vweird.f32 %v330_v62 }
 0x208   :  { %vm257_vm6 = vmor %vm255_vm5, %vm256_vm4 }
 0x209   :  { %v252_v0 = vsub.f32 1.0, %v251_v63 }
 0x20b   :  { %v253_v2 = vmul.f32 %v330_v62, %v252_v0 }
 0x20d   :  { %v254_v4 = vadd.f32 %v330_v62, %v253_v2 }
 0x20f   :  { %v258_v6 = vsel %vm257_vm6, %v330_v62, %v254_v4 }
 0x210   :  { %v263_v7 = vsel %vm260_vm7, %v262_v5, %v258_v6 }
 0x211   :  { %265 = vst [vmem:[#allocation2] sm:$0x3] %v263_v7 }
 0x212   :  { %276 = dma.vmem_to_hbm [thread:$0]  %s272_s5, 32, %s274_s12, [#allocation3]  }
 0x213   :  { %355 = dma.done.wait [#allocation3], 32  }
 0x214   :  { %356 = vsyncadd [#allocation3], 4294967264 }
 0x215   :  { %281 = vsyncpa [#allocation3], 1 }

</bundles_post_ra>
